<compile_context>
chip_gen: v7x
topology: tpu7x:2x2x1
jax: 0.10.0
libtpu: 0.0.40
codegen_flags: <defaults>
</compile_context>

<pallas_src>
import functools
import math

import jax
import jax.numpy as jnp
from jax.experimental import pallas as pl
from jax.experimental.pallas import tpu as pltpu

_INV_SQRT2 = 1.0 / math.sqrt(2.0)
_SQRT_2_OVER_PI = math.sqrt(2.0 / math.pi)
_GELU_TANH_C = 0.044715

# Abramowitz & Stegun 7.1.26 erf approximation, |error| <= 1.5e-7.
_AS_P = 0.3275911
_AS_A = (0.254829592, -0.284496736, 1.421413741, -1.453152027, 1.061405429)

_SUB, _LANE = 8, 128


def _erf_via_exp(x):
    """erf(x) with the heavy transcendental (exp) on the EUP, not a VALU poly."""
    ax = jnp.abs(x)
    t = 1.0 / (1.0 + _AS_P * ax)           # lowers to vrcp (EUP) + Newton steps
    a1, a2, a3, a4, a5 = _AS_A
    poly = t * (a1 + t * (a2 + t * (a3 + t * (a4 + t * a5))))
    y = 1.0 - poly * jnp.exp(x * -x)        # exp -> EUP
    return jnp.where(x < 0.0, -y, y)


def _scaled_act_kernel(x_ref, scales_ref, o_ref, *, approximate):
    """gelu(x) * (0.5 / scales) on one (TILE_R, TILE_H) tile.

    x_ref:      (TILE_R, TILE_H) input tile
    scales_ref: (1, TILE_H)      per-channel scales (broadcast over rows)
    o_ref:      (TILE_R, TILE_H) output tile
    """
    x = x_ref[...].astype(jnp.float32)
    s = scales_ref[...].astype(jnp.float32)

    # Per-tile reciprocal of the (1, TILE_H) scales row with GELU's leading 0.5
    # folded in.  Kept in-kernel (hoisting to the JAX wrapper is a known
    # anti-pattern); cost is one narrow op per tile and is fully hidden.
    f = 0.5 * pl.reciprocal(s, approx=False)            # (1, TILE_H)

    if approximate:
        # PyTorch nn.GELU(approximate='tanh'): one EUP tanh + a few VALU ops.
        inner = _SQRT_2_OVER_PI * (x + _GELU_TANH_C * (x * x * x))
        g = x * (1.0 + jnp.tanh(inner))
    else:
        # Exact GELU via the exp-based erf above (matches nn.GELU() to ~1e-6).
        g = x * (1.0 + _erf_via_exp(x * _INV_SQRT2))

    # Note: masked tail blocks may compute GELU on stale padded rows; the
    # store below is masked to the valid region, so results are unaffected.
    o_ref[...] = (g * f).astype(o_ref.dtype)


def _vmem_budget_bytes() -> int:
    """Plan against real per-core VMEM with ~25% headroom (v7x = 64 MiB)."""
    cap = 64 * 1024 * 1024
    try:
        cap = int(getattr(pltpu.get_tpu_info(), "vmem_capacity_bytes", cap))
    except Exception:
        pass
    return int(min(cap * 3 // 4, 96 * 1024 * 1024))


def _select_tiles(rows: int, hidden: int, itemsize: int, budget: int):
    """Pick (tile_rows, tile_h).

    Prefer an untiled hidden dim (lane-dense stores, scales fetched once, no
    degenerate divisor search); only tile H when even an 8-row slab would not
    fit the double-buffered in+out budget (H > several hundred thousand)."""

    def rows_that_fit(th):
        # Double-buffered input + output tiles: 4 * tr * th * itemsize bytes.
        return max(budget // (4 * th * itemsize), 1)

    if rows <= _SUB:
        return rows, hidden                               # full-dim blocks
    tr = min(rows, 1024, rows_that_fit(hidden))
    if tr >= _SUB:
        return (tr // _SUB) * _SUB, hidden

    # Fallback: lane-dense hidden tile (multiple of 128), masked tail on H.
    th = max(_LANE, min((rows_that_fit(_SUB) // _LANE) * _LANE, 4096))
    tr = max(_SUB, min((rows_that_fit(th) // _SUB) * _SUB, 1024))
    return tr, th


def scaled_activation(x: jax.Array, scales: jax.Array, *,
                      approximate: bool = False) -> jax.Array:
    """gelu(x) / scales with scales broadcast along the last dim.

    x:      (..., H)  (typically (B, S, H); math done in f32)
    scales: (H,)
    """
    *lead, H = x.shape
    assert scales.shape == (H,)
    rows = 1
    for d in lead:
        rows *= int(d)

    x2d = x.reshape(rows, H)
    scales2d = scales.reshape(1, H)

    budget = _vmem_budget_bytes()
    tr, th = _select_tiles(rows, H, x.dtype.itemsize, budget)

    # H is the OUTER grid axis so the (1, th) scales block index is invariant
    # over the (long, fast) inner rows axis -> fetched once, never re-DMA'd.
    grid = (pl.cdiv(H, th), pl.cdiv(rows, tr))

    needed = 4 * tr * th * x.dtype.itemsize + 4 * th * scales.dtype.itemsize
    vmem_limit = int(min(budget, max(needed + needed // 2, 16 * 1024 * 1024)))

    kernel = functools.partial(_scaled_act_kernel, approximate=approximate)

    out2d = pl.pallas_call(
        kernel,
        out_shape=jax.ShapeDtypeStruct((rows, H), x.dtype),
        grid_spec=pltpu.PrefetchScalarGridSpec(
            num_scalar_prefetch=0,
            grid=grid,
            in_specs=[
                pl.BlockSpec((tr, th), lambda j, i: (i, j)),   # input tile
                pl.BlockSpec((1, th), lambda j, i: (0, j)),    # scales slice
            ],
            out_specs=pl.BlockSpec((tr, th), lambda j, i: (i, j)),
        ),
        compiler_params=pltpu.CompilerParams(
            dimension_semantics=("parallel", "parallel"),
            vmem_limit_bytes=vmem_limit,
        ),
    )(x2d, scales2d)

    return out2d.reshape(*lead, H)


# ----------------------------------------------------------------------------
# References (pure JAX) and self-test.
# ----------------------------------------------------------------------------
def _ref_exact(x, scales):
    x32 = x.astype(jnp.float32)
    act = 0.5 * x32 * (1.0 + jax.lax.erf(x32 * _INV_SQRT2))
    return (act / scales.reshape(1, 1, -1).astype(jnp.float32)).astype(x.dtype)


def _ref_tanh(x, scales):
    x32 = x.astype(jnp.float32)
    inner = _SQRT_2_OVER_PI * (x32 + _GELU_TANH_C * x32 * x32 * x32)
    act = 0.5 * x32 * (1.0 + jnp.tanh(inner))
    return (act / scales.reshape(1, 1, -1).astype(jnp.float32)).astype(x.dtype)


if __name__ == "__main__":
    key = jax.random.PRNGKey(0)
    k1, k2, k3, k4 = jax.random.split(key, 4)

    # Test 1: aligned shapes, exact-GELU path (default, matches nn.GELU()).
    B, S, H = 2, 8, 128
    x = jax.random.normal(k1, (B, S, H), dtype=jnp.float32)
    scales = 0.5 + jax.random.uniform(k2, (H,), dtype=jnp.float32)
    out = jax.block_until_ready(scaled_activation(x, scales))
    assert out.shape == (B, S, H)
    assert jnp.allclose(out, _ref_exact(x, scales), atol=1e-5, rtol=1e-5), \
        "mismatch (aligned, exact GELU)"

    # Test 2: awkward shapes (rows not a multiple of 8, H not a multiple of
    # 128) -> exercises the masked row-tail path and full-H block exemption.
    B2, S2, H2 = 3, 5, 96
    x2 = jax.random.normal(k3, (B2, S2, H2), dtype=jnp.float32)
    scales2 = 0.5 + jax.random.uniform(k4, (H2,), dtype=jnp.float32)
    out2 = jax.block_until_ready(scaled_activation(x2, scales2))
    assert out2.shape == (B2, S2, H2)
    assert jnp.allclose(out2, _ref_exact(x2, scales2), atol=1e-5, rtol=1e-5), \
        "mismatch (tail, exact GELU)"

    # Test 3: tanh-approx GELU path (PyTorch nn.GELU(approximate='tanh')).
    out3 = jax.block_until_ready(scaled_activation(x, scales, approximate=True))
    assert jnp.allclose(out3, _ref_tanh(x, scales), atol=1e-5, rtol=1e-5), \
        "mismatch (tanh GELU)"

    print("KERNEL_OK")
</pallas_src>

<mosaic_0001>
module attributes {stable_mosaic.version = 11 : i64} {
  func.func @_scaled_act_kernel(%arg0: i32, %arg1: i32, %arg2: memref<16x128xf32, #tpu.memory_space<vmem>>, %arg3: memref<1x128xf32, #tpu.memory_space<vmem>>, %arg4: memref<16x128xf32, #tpu.memory_space<vmem>>) attributes {dimension_semantics = [#tpu.dimension_semantics<parallel>, #tpu.dimension_semantics<parallel>], iteration_bounds = array<i64: 1, 1>, scalar_prefetch = 0 : i64, scratch_operands = 0 : i64, tpu.core_type = #tpu.core_type<tc>, window_params = [{transform_indices = @transform_0, window_bounds = array<i64: 16, 128>}, {transform_indices = @transform_1, window_bounds = array<i64: 1, 128>}, {transform_indices = @transform_2, window_bounds = array<i64: 16, 128>}]} {
    %c0 = arith.constant 0 : index
    %c0_0 = arith.constant 0 : index
    %0 = vector.load %arg2[%c0, %c0_0] : memref<16x128xf32, #tpu.memory_space<vmem>>, vector<16x128xf32>
    %c0_1 = arith.constant 0 : index
    %c0_2 = arith.constant 0 : index
    %1 = vector.load %arg3[%c0_1, %c0_2] : memref<1x128xf32, #tpu.memory_space<vmem>>, vector<1x128xf32>
    %2 = tpu.reciprocal %1 : vector<1x128xf32> -> vector<1x128xf32>
    %cst = arith.constant 5.000000e-01 : f32
    %3 = vector.broadcast %cst : f32 to vector<1x128xf32>
    %4 = arith.mulf %3, %2 : vector<1x128xf32>
    %cst_3 = arith.constant 0.707106769 : f32
    %5 = vector.broadcast %cst_3 : f32 to vector<16x128xf32>
    %6 = arith.mulf %0, %5 : vector<16x128xf32>
    %7 = math.absf %6 : vector<16x128xf32>
    %cst_4 = arith.constant 0.327591091 : f32
    %8 = vector.broadcast %cst_4 : f32 to vector<16x128xf32>
    %9 = arith.mulf %8, %7 : vector<16x128xf32>
    %cst_5 = arith.constant 1.000000e+00 : f32
    %10 = vector.broadcast %cst_5 : f32 to vector<16x128xf32>
    %11 = arith.addf %10, %9 : vector<16x128xf32>
    %cst_6 = arith.constant 1.000000e+00 : f32
    %12 = vector.broadcast %cst_6 : f32 to vector<16x128xf32>
    %13 = arith.divf %12, %11 : vector<16x128xf32>
    %cst_7 = arith.constant 1.06140542 : f32
    %14 = vector.broadcast %cst_7 : f32 to vector<16x128xf32>
    %15 = arith.mulf %13, %14 : vector<16x128xf32>
    %cst_8 = arith.constant -1.45315206 : f32
    %16 = vector.broadcast %cst_8 : f32 to vector<16x128xf32>
    %17 = arith.addf %16, %15 : vector<16x128xf32>
    %18 = arith.mulf %13, %17 : vector<16x128xf32>
    %cst_9 = arith.constant 1.42141378 : f32
    %19 = vector.broadcast %cst_9 : f32 to vector<16x128xf32>
    %20 = arith.addf %19, %18 : vector<16x128xf32>
    %21 = arith.mulf %13, %20 : vector<16x128xf32>
    %cst_10 = arith.constant -0.284496725 : f32
    %22 = vector.broadcast %cst_10 : f32 to vector<16x128xf32>
    %23 = arith.addf %22, %21 : vector<16x128xf32>
    %24 = arith.mulf %13, %23 : vector<16x128xf32>
    %cst_11 = arith.constant 0.254829586 : f32
    %25 = vector.broadcast %cst_11 : f32 to vector<16x128xf32>
    %26 = arith.addf %25, %24 : vector<16x128xf32>
    %27 = arith.mulf %13, %26 : vector<16x128xf32>
    %cst_12 = arith.constant 0.000000e+00 : f32
    %28 = vector.broadcast %cst_12 : f32 to vector<16x128xf32>
    %29 = arith.subf %28, %6 : vector<16x128xf32>
    %30 = arith.mulf %6, %29 : vector<16x128xf32>
    %31 = math.exp %30 : vector<16x128xf32>
    %32 = arith.mulf %27, %31 : vector<16x128xf32>
    %cst_13 = arith.constant 1.000000e+00 : f32
    %33 = vector.broadcast %cst_13 : f32 to vector<16x128xf32>
    %34 = arith.subf %33, %32 : vector<16x128xf32>
    %cst_14 = arith.constant 0.000000e+00 : f32
    %35 = vector.broadcast %cst_14 : f32 to vector<16x128xf32>
    %36 = arith.cmpf olt, %6, %35 : vector<16x128xf32>
    %cst_15 = arith.constant 0.000000e+00 : f32
    %37 = vector.broadcast %cst_15 : f32 to vector<16x128xf32>
    %38 = arith.subf %37, %34 : vector<16x128xf32>
    %39 = arith.select %36, %38, %34 : vector<16x128xi1>, vector<16x128xf32>
    %cst_16 = arith.constant 1.000000e+00 : f32
    %40 = vector.broadcast %cst_16 : f32 to vector<16x128xf32>
    %41 = arith.addf %40, %39 : vector<16x128xf32>
    %42 = arith.mulf %0, %41 : vector<16x128xf32>
    %43 = vector.broadcast %4 : vector<1x128xf32> to vector<16x128xf32>
    %44 = arith.mulf %42, %43 : vector<16x128xf32>
    %c0_17 = arith.constant 0 : index
    %c0_18 = arith.constant 0 : index
    %45 = vector.load %arg4[%c0_17, %c0_18] : memref<16x128xf32, #tpu.memory_space<vmem>>, vector<16x128xf32>
    tpu.vector_store %arg4[%c0_17, %c0_18], %44 {strides = array<i32>} : memref<16x128xf32, #tpu.memory_space<vmem>>, vector<16x128xf32>,
    return
  }
  func.func @transform_0(%arg0: i32, %arg1: i32) -> (i32, i32) {
    %c0_i32 = arith.constant 0 : i32
    return %arg1, %arg0 : i32, i32
  }
  func.func @transform_1(%arg0: i32, %arg1: i32) -> (i32, i32) {
    %c0_i32 = arith.constant 0 : i32
    %c0_i32_0 = arith.constant 0 : i32
    return %c0_i32, %arg0 : i32, i32
  }
  func.func @transform_2(%arg0: i32, %arg1: i32) -> (i32, i32) {
    %c0_i32 = arith.constant 0 : i32
    return %arg1, %arg0 : i32, i32
  }
}

</mosaic_0001>

<bundles_post_ra>
// kernel: tpu_custom_call.1
= control target key start
LH: loop header
LB: loop body
LE: loop exit
PB: predicated region body
PF: predicated region fallthrough
CT: control target
= control target key end

     0   :  { %7 = vsyncpa [#allocation3], 0  ;;  %s228_s0 = inlined_call_operand.hbm [shape: f32[16,128], index: 0, kind: input, shape index: {}]   ;;  %s229_s1 = inlined_call_operand.vmem [shape: f32[1,128], index: 1, kind: input, shape index: {}]   ;;  %s230_s2 = inlined_call_operand.hbm [shape: f32[16,128], index: 2, kind: output, shape index: {}]  }
   0x1   :  { %8 = vsyncpa [#allocation4], 0  ;;  %s172_s9 = smov [#allocation2]   ;;  %s124_s13 = scalar_lea.hbm %s228_s0, 256 }
   0x2   :  { %s14_s10 = sshll.u32 %s172_s9, 4  ;;  %p125_p0 = scmp.ne.s32.totalorder %s228_s0, %s124_s13  ;;  %s15_s10 = int_to_ptr.vmem [resolvable:$true] %s14_s10 }
   0x3   :  { %p128_p1 = scmp.lt.u32.totalorder %s124_s13, %s228_s0 }
   0x5   :  { %p130_p2 = pnand %p128_p1, %p125_p0 }
   0x7   :  { %133 = shalt.err (!%p130_p2)
}
   0x8   :  { %s134_s18 = scalar_lea.vmem %s15_s10, 256  ;;  %p139_p4 = scmp.lt.s32.totalorder %s15_s10, %s15_s10 }
   0x9   :  { %p135_p3 = scmp.ne.s32.totalorder %s15_s10, %s134_s18  ;;  %p140_p5 = scmp.lt.s32.totalorder %s134_s18, %s134_s18 }
   0xb   :  { %p141_p6 = por %p140_p5, %p139_p4 }
   0xd   :  { %p142_p7 = pnand %p141_p6, %p135_p3 }
   0xf   :  { %145 = shalt.err (!%p142_p7)
}
  0x10   :  { %s173_s19 = smov 128   ;;  %s174_s20 = smov 8  }
  0x11   :  { %20 = dma.hbm_to_vmem [thread:$0]  %s228_s0, 256, %s15_s10, [#allocation3], %s173_s19, %s173_s19, %s174_s20  }
  0x12   :  { %168 = dma.done.wait [#allocation3], 256  }
  0x13   :  { %169 = vsyncadd [#allocation3], 4294967040  ;;  %v26_v0 = vld [vmem:[#allocation2] sm:$0xff]  ;;  %v206_v1 = vld [vmem:[#allocation2 + $0x8] sm:$0xff]  ;;  %v84_v32 = vlaneseq }
  0x14   :  { %v31_v2 = vmul.f32 0.70710677, %v26_v0  ;;  %v32_v3 = vmul.f32 0.70710677, %v206_v1  ;;  %v28_v23 = vld [vmem:[%s229_s1] sm:$0x1] }
  0x15   :  { %v85_v39 = vshrl.u32 %v84_v32, 7  ;;  %s175_s1 = smov [#allocation5]  }
  0x16   :  { %v33_v4 = vand.u32 2147483647, %v31_v2  ;;  %v34_v5 = vand.u32 2147483647, %v32_v3  ;;  %v61_v10 = vsub.f32 0.0, %v31_v2  ;;  %v62_v11 = vsub.f32 0.0, %v32_v3 }
  0x17   :  { %vm73_vm0 = vcmp.lt.f32.partialorder %v31_v2, 0.0  ;;  %v86_v46 = vsub.s32 0, %v85_v39  ;;  %vm74_vm1 = vcmp.lt.f32.partialorder %v32_v3, 0.0  ;;  %s98_s24 = sshll.u32 %s175_s1, 4  ;;  %s99_s24 = int_to_ptr.vmem [resolvable:$true] %s98_s24 }
  0x18   :  { %v35_v6 = vmul.f32 0.3275911, %v33_v4  ;;  %v36_v7 = vmul.f32 0.3275911, %v34_v5  ;;  %v63_v12 = vmul.f32 %v61_v10, %v31_v2  ;;  %v64_v14 = vmul.f32 %v62_v11, %v32_v3  ;;  %s146_s25 = scalar_lea.vmem %s99_s24, 256  ;;  %p151_p9 = scmp.lt.s32.totalorder %s99_s24, %s99_s24 }
  0x19   :  { %p147_p8 = scmp.ne.s32.totalorder %s99_s24, %s146_s25  ;;  %p152_p10 = scmp.lt.s32.totalorder %s146_s25, %s146_s25 }
  0x1a   :  { %v37_v8 = vadd.f32 1.0, %v35_v6  ;;  %v38_v9 = vadd.f32 1.0, %v36_v7  ;;  %v65_v17 = vmul.f32 1.442695, %v63_v12  ;;  %v67_v20 = vmul.f32 1.442695, %v64_v14 }
  0x1b   :  { %p153_p11 = por %p152_p10, %p151_p9 }
  0x1c   :  { %114 = vrcp.f32 %v37_v8 }
  0x1d   :  { %116 = vrcp.f32 %v38_v9  ;;  %p154_p12 = pnand %p153_p11, %p147_p8 }
  0x1e   :  { %118 = vpow2.f32 %v65_v17 }
  0x1f   :  { %120 = vpow2.f32 %v67_v20 }
  0x20   :  { %122 = vrcp.f32 %v28_v23 }
  0x26   :  { %v115_v13 = vpop.eup %114 }
  0x27   :  { %v43_v15 = vmul.f32 1.0614054, %v115_v13  ;;  %v117_v16 = vpop.eup %116 }
  0x28   :  { %v44_v19 = vmul.f32 1.0614054, %v117_v16  ;;  %v119_v35 = vpop.eup %118 }
  0x29   :  { %v45_v18 = vadd.f32 -1.4531521, %v43_v15  ;;  %v121_v38 = vpop.eup %120 }
  0x2a   :  { %v46_v22 = vadd.f32 -1.4531521, %v44_v19  ;;  %v123_v40 = vpop.eup %122 }
  0x2b   :  { %v47_v21 = vmul.f32 %v115_v13, %v45_v18  ;;  %v30_v45 = vmul.f32 0.5, %v123_v40 }
  0x2c   :  { %v48_v25 = vmul.f32 %v117_v16, %v46_v22 }
  0x2d   :  { %v49_v24 = vadd.f32 1.4214138, %v47_v21  ;;  %v87_v52 = vrot.slane %v30_v45, %v86_v46 }
  0x2e   :  { %v50_v27 = vadd.f32 1.4214138, %v48_v25 }
  0x2f   :  { %v51_v26 = vmul.f32 %v115_v13, %v49_v24 }
  0x30   :  { %v52_v29 = vmul.f32 %v117_v16, %v50_v27 }
  0x31   :  { %v53_v28 = vadd.f32 -0.28449672, %v51_v26 }
  0x32   :  { %v54_v31 = vadd.f32 -0.28449672, %v52_v29 }
  0x33   :  { %v55_v30 = vmul.f32 %v115_v13, %v53_v28 }
  0x34   :  { %v56_v34 = vmul.f32 %v117_v16, %v54_v31 }
  0x35   :  { %v57_v33 = vadd.f32 0.2548296, %v55_v30 }
  0x36   :  { %v58_v37 = vadd.f32 0.2548296, %v56_v34 }
  0x37   :  { %v59_v36 = vmul.f32 %v115_v13, %v57_v33 }
  0x38   :  { %v60_v42 = vmul.f32 %v117_v16, %v58_v37 }
  0x39   :  { %v69_v41 = vmul.f32 %v119_v35, %v59_v36 }
  0x3a   :  { %v70_v44 = vmul.f32 %v121_v38, %v60_v42 }
  0x3b   :  { %v71_v43 = vsub.f32 1.0, %v69_v41 }
  0x3c   :  { %v72_v48 = vsub.f32 1.0, %v70_v44 }
  0x3d   :  { %v75_v47 = vsub.f32 0.0, %v71_v43 }
  0x3e   :  { %v76_v50 = vsub.f32 0.0, %v72_v48 }
  0x3f   :  { %v77_v49 = vsel %vm73_vm0, %v75_v47, %v71_v43 }
  0x40   :  { %v79_v51 = vadd.f32 1.0, %v77_v49  ;;  %v78_v53 = vsel %vm74_vm1, %v76_v50, %v72_v48 }
  0x41   :  { %v80_v55 = vadd.f32 1.0, %v78_v53 }
  0x42   :  { %v81_v54 = vmul.f32 %v79_v51, %v26_v0 }
  0x43   :  { %v82_v57 = vmul.f32 %v80_v55, %v206_v1 }
  0x44   :  { %v89_v56 = vmul.f32 %v87_v52, %v81_v54 }
  0x45   :  { %v90_v58 = vmul.f32 %v87_v52, %v82_v57 }
  0x46   :  { %91 = vst [vmem:[#allocation5] sm:$0xff] %v89_v56 }
  0x47   :  { %92 = vst [vmem:[#allocation5 + $0x8] sm:$0xff] %v90_v58 }
  0x48   :  { %157 = shalt.err (!%p154_p12)
}
  0x49   :  { %s158_s28 = scalar_lea.hbm %s230_s2, 256 }
  0x4a   :  { %p159_p13 = scmp.ne.s32.totalorder %s230_s2, %s158_s28  ;;  %p162_p0 = scmp.lt.u32.totalorder %s158_s28, %s230_s2 }
  0x4c   :  { %p164_p1 = pnand %p162_p0, %p159_p13 }
  0x4e   :  { %167 = shalt.err (!%p164_p1)
}
  0x4f   :  { %104 = dma.vmem_to_hbm [thread:$0]  %s99_s24, 256, %s230_s2, [#allocation4], %s173_s19, %s173_s19, %s174_s20  }
  0x50   :  { %170 = dma.done.wait [#allocation4], 256  }
  0x51   :  { %171 = vsyncadd [#allocation4], 4294967040 }
  0x52   :  { %108 = vsyncpa [#allocation3], 1 }
  0x53   :  { %109 = vsyncpa [#allocation4], 1 }

</bundles_post_ra>
